<compile_context>
chip_gen: v7x
topology: tpu7x:2x2x1
jax: 0.10.0
libtpu: 0.0.40
codegen_flags: <defaults>
</compile_context>

<pallas_src>
import jax
import jax.numpy as jnp
from jax.experimental import pallas as pl
from jax.experimental.pallas import tpu as pltpu

IN_FEATURES = 784
HIDDEN = 20
TB_CAP = 2048        # max rows per batch tile (v5e scoped-VMEM safe for f32 in)
SMALL_BATCH = 512    # below this, use a single exact block (tb == B)


def _round_up(x, m):
    return ((x + m - 1) // m) * m


def _choose_batch_tile(B, cap=TB_CAP):
    """Batch tile size: exact single block for small B; for large B an even
    number of ~equal tiles (<= cap rows, 16-row aligned) so v7x megacore gets
    a balanced 'parallel' grid."""
    if B <= SMALL_BATCH:
        return B                          # block dim == full array dim: legal
    num = pl.cdiv(B, cap)
    if num % 2:
        num += 1                          # even grid -> both v7x TCs busy
    return _round_up(pl.cdiv(B, num), 16)


def fcnet_kernel(x_ref, w_ref, b_ref, o_ref):
    # One (tb, 784) f32 activation tile -> (tb, 20) f32 log-probs.
    x = x_ref[...].astype(jnp.bfloat16)              # cast in VMEM (no HBM cost)
    w = w_ref[...].astype(jnp.bfloat16)              # (784, 20), VMEM-resident
    b = b_ref[...]                                   # (1, 20) f32

    # MXU matmul, f32 accumulation; bias + relu in f32.
    h = jnp.dot(x, w, preferred_element_type=jnp.float32) + b   # (tb, 20)
    h = jnp.maximum(h, 0.0)                          # relu
    # Dropout(p=0.5): eval-mode forward => identity.
    # TODO(synk): training-mode dropout would need pltpu.prng_seed +
    # pltpu.prng_random_bits to build a Bernoulli mask and scale by 1/(1-p).
    # (The second relu in the PyTorch forward is a no-op after relu.)

    # Numerically stable log_softmax over dim=1.
    m = jnp.max(h, axis=-1, keepdims=True)
    s = h - m
    lse = jnp.log(jnp.sum(jnp.exp(s), axis=-1, keepdims=True))
    o_ref[...] = (s - lse).astype(o_ref.dtype)


@jax.jit
def fcnet_forward(x_nchw, w1, b1):
    """x_nchw: (B, 1, 28, 28) float; w1: (784, 20); b1: (20,). Returns (B, 20) f32."""
    B = x_nchw.shape[0]
    x_flat = x_nchw.reshape(B, -1)                   # metadata reshape only
    assert x_flat.shape[1] == IN_FEATURES
    b_row = b1.reshape(1, HIDDEN).astype(jnp.float32)

    tb = _choose_batch_tile(B)
    grid = (pl.cdiv(B, tb),)                         # ragged last block is OK

    cost = pl.CostEstimate(
        flops=2 * B * IN_FEATURES * HIDDEN,
        transcendentals=2 * B * HIDDEN,              # exp + log
        bytes_accessed=(B * IN_FEATURES * x_flat.dtype.itemsize   # x
                        + IN_FEATURES * HIDDEN * 4                # w
                        + HIDDEN * 4                              # bias
                        + B * HIDDEN * 4),                        # out
    )

    out = pl.pallas_call(
        fcnet_kernel,
        out_shape=jax.ShapeDtypeStruct((B, HIDDEN), jnp.float32),
        grid=grid,
        in_specs=[
            pl.BlockSpec((tb, IN_FEATURES), lambda i: (i, 0)),    # walks batch
            pl.BlockSpec((IN_FEATURES, HIDDEN), lambda i: (0, 0)),  # resident
            pl.BlockSpec((1, HIDDEN), lambda i: (0, 0)),            # resident
        ],
        out_specs=pl.BlockSpec((tb, HIDDEN), lambda i: (i, 0)),
        compiler_params=pltpu.CompilerParams(
            dimension_semantics=("parallel",),       # megacore shard on v7x
            vmem_limit_bytes=32 * 1024 * 1024,       # headroom on every chip
        ),
        cost_estimate=cost,
    )(x_flat, w1, b_row)

    return out


def init_params(key):
    """Deterministic init mimicking nn.Linear default (uniform +-1/sqrt(fan_in))."""
    k1, k2 = jax.random.split(key)
    bound = 1.0 / (IN_FEATURES ** 0.5)
    w1 = jax.random.uniform(k1, (IN_FEATURES, HIDDEN), jnp.float32,
                            minval=-bound, maxval=bound)
    b1 = jax.random.uniform(k2, (HIDDEN,), jnp.float32,
                            minval=-bound, maxval=bound)
    # NOTE: fc2 (20 -> 10) exists in __init__ but is unused in forward, so it
    # is intentionally not materialized here.
    return w1, b1


def _reference(x_nchw, w1, b1):
    # Pure-JAX reference mirroring the kernel's in-VMEM bf16 operand cast
    # (f32 accumulation). Inference-grade approximation of the f32 PyTorch ref.
    B = x_nchw.shape[0]
    x = x_nchw.reshape(B, -1).astype(jnp.bfloat16).astype(jnp.float32)
    w = w1.astype(jnp.bfloat16).astype(jnp.float32)
    h = jnp.maximum(x @ w + b1.reshape(1, HIDDEN), 0.0)
    return jax.nn.log_softmax(h, axis=1)


def _check(x, w1, b1):
    out = jax.block_until_ready(fcnet_forward(x, w1, b1))
    B = x.shape[0]
    assert out.shape == (B, HIDDEN)
    row_sums = jnp.sum(jnp.exp(out), axis=1)
    assert bool(jnp.all(jnp.abs(row_sums - 1.0) < 1e-4))
    ref = _reference(x, w1, b1)
    assert bool(jnp.all(jnp.abs(out - ref) < 1e-2))
    return out


if __name__ == "__main__":
    key = jax.random.PRNGKey(0)
    kx, kx2, kp = jax.random.split(key, 3)

    w1, b1 = init_params(kp)

    # Small MNIST-shaped batch: single exact block path.
    x_small = jax.random.normal(kx, (2, 1, 28, 28), jnp.float32)
    _check(x_small, w1, b1)

    # Larger odd batch: exercises the multi-tile grid + ragged last block.
    x_big = jax.random.normal(kx2, (600, 1, 28, 28), jnp.float32)
    _check(x_big, w1, b1)

    print("KERNEL_OK")
</pallas_src>

<mosaic_0001>
module attributes {stable_mosaic.version = 11 : i64} {
  func.func @fcnet_kernel(%arg0: i32, %arg1: memref<2x784xf32, #tpu.memory_space<vmem>>, %arg2: memref<784x20xf32, #tpu.memory_space<vmem>>, %arg3: memref<1x20xf32, #tpu.memory_space<vmem>>, %arg4: memref<2x20xf32, #tpu.memory_space<vmem>>) attributes {dimension_semantics = [#tpu.dimension_semantics<parallel>], iteration_bounds = array<i64: 1>, scalar_prefetch = 0 : i64, scratch_operands = 0 : i64, tpu.core_type = #tpu.core_type<tc>, window_params = [{transform_indices = @transform_0, window_bounds = array<i64: 2, 784>}, {pipeline_mode = #tpu.pipeline_mode<synchronous>, transform_indices = @transform_1, window_bounds = array<i64: 784, 20>}, {pipeline_mode = #tpu.pipeline_mode<synchronous>, transform_indices = @transform_2, window_bounds = array<i64: 1, 20>}, {transform_indices = @transform_3, window_bounds = array<i64: 2, 20>}]} {
    %c0 = arith.constant 0 : index
    %c0_0 = arith.constant 0 : index
    %0 = vector.load %arg1[%c0, %c0_0] : memref<2x784xf32, #tpu.memory_space<vmem>>, vector<2x784xf32>
    %1 = arith.truncf %0 : vector<2x784xf32> to vector<2x784xbf16>
    %c0_1 = arith.constant 0 : index
    %c0_2 = arith.constant 0 : index
    %2 = vector.load %arg2[%c0_1, %c0_2] : memref<784x20xf32, #tpu.memory_space<vmem>>, vector<784x20xf32>
    %3 = arith.truncf %2 : vector<784x20xf32> to vector<784x20xbf16>
    %c0_3 = arith.constant 0 : index
    %c0_4 = arith.constant 0 : index
    %4 = vector.load %arg3[%c0_3, %c0_4] : memref<1x20xf32, #tpu.memory_space<vmem>>, vector<1x20xf32>
    %cst = arith.constant dense<0.000000e+00> : vector<2x20xf32>
    %5 = tpu.matmul %1, %3, %cst {dimension_numbers = #tpu.dot_dimension_numbers<[1], [0], [0], [1], [0, 0, 1, 1], [], []>} : vector<2x784xbf16>, vector<784x20xbf16>, vector<2x20xf32> -> vector<2x20xf32>
    %6 = vector.broadcast %4 : vector<1x20xf32> to vector<2x20xf32>
    %7 = arith.addf %5, %6 : vector<2x20xf32>
    %cst_5 = arith.constant 0.000000e+00 : f32
    %8 = vector.broadcast %cst_5 : f32 to vector<2x20xf32>
    %9 = arith.maximumf %7, %8 : vector<2x20xf32>
    %cst_6 = arith.constant dense<0xFF800000> : vector<2xf32>
    %10 = vector.multi_reduction <maximumf>, %9, %cst_6 [1] : vector<2x20xf32> to vector<2xf32>
    %11 = vector.shape_cast %10 : vector<2xf32> to vector<2x1xf32>
    %12 = vector.broadcast %11 : vector<2x1xf32> to vector<2x20xf32>
    %13 = arith.subf %9, %12 : vector<2x20xf32>
    %14 = math.exp %13 : vector<2x20xf32>
    %cst_7 = arith.constant dense<0.000000e+00> : vector<2xf32>
    %15 = vector.multi_reduction <add>, %14, %cst_7 [1] : vector<2x20xf32> to vector<2xf32>
    %16 = vector.shape_cast %15 : vector<2xf32> to vector<2x1xf32>
    %17 = math.log %16 : vector<2x1xf32>
    %18 = vector.broadcast %17 : vector<2x1xf32> to vector<2x20xf32>
    %19 = arith.subf %13, %18 : vector<2x20xf32>
    %c0_8 = arith.constant 0 : index
    %c0_9 = arith.constant 0 : index
    %20 = vector.load %arg4[%c0_8, %c0_9] : memref<2x20xf32, #tpu.memory_space<vmem>>, vector<2x20xf32>
    tpu.vector_store %arg4[%c0_8, %c0_9], %19 {strides = array<i32>} : memref<2x20xf32, #tpu.memory_space<vmem>>, vector<2x20xf32>,
    return
  }
  func.func @transform_0(%arg0: i32) -> (i32, i32) {
    %c0_i32 = arith.constant 0 : i32
    %c0_i32_0 = arith.constant 0 : i32
    return %arg0, %c0_i32 : i32, i32
  }
  func.func @transform_1(%arg0: i32) -> (i32, i32) {
    %c0_i32 = arith.constant 0 : i32
    %c0_i32_0 = arith.constant 0 : i32
    %c0_i32_1 = arith.constant 0 : i32
    return %c0_i32, %c0_i32_0 : i32, i32
  }
  func.func @transform_2(%arg0: i32) -> (i32, i32) {
    %c0_i32 = arith.constant 0 : i32
    %c0_i32_0 = arith.constant 0 : i32
    %c0_i32_1 = arith.constant 0 : i32
    return %c0_i32, %c0_i32_0 : i32, i32
  }
  func.func @transform_3(%arg0: i32) -> (i32, i32) {
    %c0_i32 = arith.constant 0 : i32
    %c0_i32_0 = arith.constant 0 : i32
    return %arg0, %c0_i32 : i32, i32
  }
}

</mosaic_0001>

<bundles_post_ra>
// kernel: fcnet_forward.1
= control target key start
LH: loop header
LB: loop body
LE: loop exit
PB: predicated region body
PF: predicated region fallthrough
CT: control target
= control target key end

     0   :  { %v524_v43 = vmov 1983009808   ;;  %v24_v45 = vlaneseq  ;;  %s878_s0 = inlined_call_operand.vmem [shape: f32[2,784], index: 0, kind: input, shape index: {}]   ;;  %s879_s1 = inlined_call_operand.vmem [shape: f32[784,20], index: 1, kind: input, shape index: {}]   ;;  %s880_s2 = inlined_call_operand.vmem [shape: f32[1,20], index: 2, kind: input, shape index: {}]   ;;  %s881_s3 = inlined_call_operand.hbm [shape: f32[2,20], index: 3, kind: output, shape index: {}]  }
   0x1   :  { %v83_v0 = vld [vmem:[%s879_s1 + $0x80] sm:$0xff]  ;;  %v84_v1 = vld [vmem:[%s879_s1 + $0x88] sm:$0xff]  ;;  %v85_v11 = vld [vmem:[%s879_s1 + $0x90] sm:$0xff]  ;;  %v22_v44 = vunpack.c.l.s4 %v524_v43 }
   0x2   :  { %v67_v2 = vld [vmem:[%s879_s1] sm:$0xff]  ;;  %v173_v3 = vpack.c.bf16 %v84_v1, %v83_v0  ;;  %v68_v4 = vld [vmem:[%s879_s1 + $0x8] sm:$0xff]  ;;  %v86_v13 = vld [vmem:[%s879_s1 + $0x98] sm:$0xff]  ;;  %v25_v60 = vshrl.u32 %v24_v45, 7 }
   0x3   :  { %v115_v5 = vld [vmem:[%s879_s1 + $0x180] sm:$0xff]  ;;  %v116_v6 = vld [vmem:[%s879_s1 + $0x188] sm:$0xff]  ;;  %v165_v7 = vpack.c.bf16 %v68_v4, %v67_v2  ;;  %v69_v14 = vld [vmem:[%s879_s1 + $0x10] sm:$0xff]  ;;  %v174_v16 = vpack.c.bf16 %v86_v13, %v85_v11  ;;  %v23_v59 = vunpack.c.0.s8 %v22_v44 }
   0x4   :  { %v189_v8 = vpack.c.bf16 %v116_v6, %v115_v5  ;;  %v99_v9 = vld [vmem:[%s879_s1 + $0x100] sm:$0xff]  ;;  %v100_v10 = vld [vmem:[%s879_s1 + $0x108] sm:$0xff]  ;;  %416 = vmatprep.subr.bf16.mxu0 %v173_v3  ;;  %v70_v15 = vld [vmem:[%s879_s1 + $0x18] sm:$0xff] }
   0x5   :  { %v181_v12 = vpack.c.bf16 %v100_v10, %v99_v9  ;;  %417 = vmatpush3.bf16.msra.mxu0 %v165_v7  ;;  %v166_v17 = vpack.c.bf16 %v70_v15, %v69_v14  ;;  %v117_v18 = vld [vmem:[%s879_s1 + $0x190] sm:$0xff]  ;;  %v118_v19 = vld [vmem:[%s879_s1 + $0x198] sm:$0xff]  ;;  %v87_v23 = vld [vmem:[%s879_s1 + $0xa0] sm:$0xff]  ;;  %v692_v10 = vsub.s32 %v23_v59, %v25_v60 }
   0x6   :  { %438 = vmatprep.subr.bf16.mxu1 %v189_v8  ;;  %v101_v20 = vld [vmem:[%s879_s1 + $0x110] sm:$0xff]  ;;  %v190_v21 = vpack.c.bf16 %v118_v19, %v117_v18  ;;  %v102_v22 = vld [vmem:[%s879_s1 + $0x118] sm:$0xff]  ;;  %v88_v24 = vld [vmem:[%s879_s1 + $0xa8] sm:$0xff]  ;;  %418 = vmatprep.subr.bf16.mxu0 %v174_v16 }
   0x7   :  { %439 = vmatpush3.bf16.msra.mxu1 %v181_v12  ;;  %v182_v25 = vpack.c.bf16 %v102_v22, %v101_v20  ;;  %v175_v26 = vpack.c.bf16 %v88_v24, %v87_v23  ;;  %v71_v27 = vld [vmem:[%s879_s1 + $0x20] sm:$0xff]  ;;  %v72_v28 = vld [vmem:[%s879_s1 + $0x28] sm:$0xff]  ;;  %v89_v35 = vld [vmem:[%s879_s1 + $0xb0] sm:$0xff] }
   0x8   :  { %v119_v29 = vld [vmem:[%s879_s1 + $0x1a0] sm:$0xff]  ;;  %440 = vmatprep.subr.bf16.mxu1 %v190_v21  ;;  %v120_v30 = vld [vmem:[%s879_s1 + $0x1a8] sm:$0xff]  ;;  %v167_v33 = vpack.c.bf16 %v72_v28, %v71_v27  ;;  %v90_v36 = vld [vmem:[%s879_s1 + $0xb8] sm:$0xff] }
   0x9   :  { %v103_v31 = vld [vmem:[%s879_s1 + $0x120] sm:$0xff]  ;;  %v104_v32 = vld [vmem:[%s879_s1 + $0x128] sm:$0xff]  ;;  %419 = vmatpush3.bf16.msra.mxu0 %v166_v17  ;;  %v191_v34 = vpack.c.bf16 %v120_v30, %v119_v29  ;;  %v73_v37 = vld [vmem:[%s879_s1 + $0x30] sm:$0xff]  ;;  %v176_v39 = vpack.c.bf16 %v90_v36, %v89_v35 }
   0xa   :  { %420 = vmatprep.subr.bf16.mxu0 %v175_v26  ;;  %v183_v38 = vpack.c.bf16 %v104_v32, %v103_v31  ;;  %v74_v40 = vld [vmem:[%s879_s1 + $0x38] sm:$0xff]  ;;  %v121_v41 = vld [vmem:[%s879_s1 + $0x1b0] sm:$0xff]  ;;  %v91_v49 = vld [vmem:[%s879_s1 + $0xc0] sm:$0xff] }
   0xb   :  { %441 = vmatpush3.bf16.msra.mxu1 %v182_v25  ;;  %v122_v42 = vld [vmem:[%s879_s1 + $0x1b8] sm:$0xff]  ;;  %v105_v47 = vld [vmem:[%s879_s1 + $0x130] sm:$0xff]  ;;  %v92_v50 = vld [vmem:[%s879_s1 + $0xc8] sm:$0xff]  ;;  %v168_v51 = vpack.c.bf16 %v74_v40, %v73_v37 }
   0xc   :  { %442 = vmatprep.subr.bf16.mxu1 %v191_v34  ;;  %v192_v46 = vpack.c.bf16 %v122_v42, %v121_v41  ;;  %v106_v48 = vld [vmem:[%s879_s1 + $0x138] sm:$0xff]  ;;  %v123_v52 = vld [vmem:[%s879_s1 + $0x1c0] sm:$0xff]  ;;  %v124_v53 = vld [vmem:[%s879_s1 + $0x1c8] sm:$0xff]  ;;  %v177_v55 = vpack.c.bf16 %v92_v50, %v91_v49 }
   0xd   :  { %421 = vmatpush3.bf16.msra.mxu0 %v167_v33  ;;  %v184_v54 = vpack.c.bf16 %v106_v48, %v105_v47  ;;  %v75_v56 = vld [vmem:[%s879_s1 + $0x40] sm:$0xff]  ;;  %v76_v57 = vld [vmem:[%s879_s1 + $0x48] sm:$0xff]  ;;  %v193_v61 = vpack.c.bf16 %v124_v53, %v123_v52  ;;  %v93_v63 = vld [vmem:[%s879_s1 + $0xd0] sm:$0xff] }
   0xe   :  { %422 = vmatprep.subr.bf16.mxu0 %v176_v39  ;;  %v107_v58 = vld [vmem:[%s879_s1 + $0x140] sm:$0xff]  ;;  %v108_v62 = vld [vmem:[%s879_s1 + $0x148] sm:$0xff]  ;;  %v94_v0 = vld [vmem:[%s879_s1 + $0xd8] sm:$0xff]  ;;  %v169_v3 = vpack.c.bf16 %v76_v57, %v75_v56 }
   0xf   :  { %443 = vmatpush3.bf16.msra.mxu1 %v183_v38  ;;  %v125_v1 = vld [vmem:[%s879_s1 + $0x1d0] sm:$0xff]  ;;  %v126_v2 = vld [vmem:[%s879_s1 + $0x1d8] sm:$0xff]  ;;  %v185_v5 = vpack.c.bf16 %v108_v62, %v107_v58  ;;  %v178_v6 = vpack.c.bf16 %v94_v0, %v93_v63  ;;  %v95_v12 = vld [vmem:[%s879_s1 + $0xe0] sm:$0xff] }
  0x10   :  { %444 = vmatprep.subr.bf16.mxu1 %v192_v46  ;;  %v77_v4 = vld [vmem:[%s879_s1 + $0x50] sm:$0xff]  ;;  %v78_v7 = vld [vmem:[%s879_s1 + $0x58] sm:$0xff]  ;;  %v194_v11 = vpack.c.bf16 %v126_v2, %v125_v1  ;;  %v96_v13 = vld [vmem:[%s879_s1 + $0xe8] sm:$0xff] }
  0x11   :  { %423 = vmatpush3.bf16.msra.mxu0 %v168_v51  ;;  %v109_v8 = vld [vmem:[%s879_s1 + $0x150] sm:$0xff]  ;;  %v110_v9 = vld [vmem:[%s879_s1 + $0x158] sm:$0xff]  ;;  %v127_v14 = vld [vmem:[%s879_s1 + $0x1e0] sm:$0xff]  ;;  %v170_v16 = vpack.c.bf16 %v78_v7, %v77_v4  ;;  %v179_v20 = vpack.c.bf16 %v96_v13, %v95_v12 }
  0x12   :  { %424 = vmatprep.subr.bf16.mxu0 %v177_v55  ;;  %v128_v15 = vld [vmem:[%s879_s1 + $0x1e8] sm:$0xff]  ;;  %v186_v17 = vpack.c.bf16 %v110_v9, %v109_v8  ;;  %v79_v18 = vld [vmem:[%s879_s1 + $0x60] sm:$0xff]  ;;  %v97_v27 = vld [vmem:[%s879_s1 + $0xf0] sm:$0xff] }
  0x13   :  { %445 = vmatpush3.bf16.msra.mxu1 %v184_v54  ;;  %v16_v19 = vld [vmem:[%s878_s0] sm:$0xff]  ;;  %v80_v21 = vld [vmem:[%s879_s1 + $0x68] sm:$0xff]  ;;  %v195_v26 = vpack.c.bf16 %v128_v15, %v127_v14  ;;  %v98_v28 = vld [vmem:[%s879_s1 + $0xf8] sm:$0xff] }
  0x14   :  { %446 = vmatprep.subr.bf16.mxu1 %v193_v61  ;;  %v111_v22 = vld [vmem:[%s879_s1 + $0x160] sm:$0xff]  ;;  %v112_v23 = vld [vmem:[%s879_s1 + $0x168] sm:$0xff]  ;;  %v27_v24 = vrot.slane %v16_v19, %v692_v10  ;;  %v20_v25 = vcombine.high %v16_v19, %v16_v19  ;;  %v129_v29 = vld [vmem:[%s879_s1 + $0x1f0] sm:$0xff]  ;;  %v171_v33 = vpack.c.bf16 %v80_v21, %v79_v18  ;;  %v180_v35 = vpack.c.bf16 %v98_v28, %v97_v27 }
  0x15   :  { %425 = vmatpush3.bf16.msra.mxu0 %v169_v3  ;;  %v130_v30 = vld [vmem:[%s879_s1 + $0x1f8] sm:$0xff]  ;;  %v187_v34 = vpack.c.bf16 %v112_v23, %v111_v22  ;;  %v81_v36 = vld [vmem:[%s879_s1 + $0x70] sm:$0xff]  ;;  %v147_v43 = vld [vmem:[%s879_s1 + $0x280] sm:$0xff] }
  0x16   :  { %426 = vmatprep.subr.bf16.mxu0 %v178_v6  ;;  %v35_v31 = vcombine.high %v27_v24, %v27_v24  ;;  %v34_v32 = vrot.slane %v20_v25, %v692_v10  ;;  %v82_v37 = vld [vmem:[%s879_s1 + $0x78] sm:$0xff]  ;;  %v113_v39 = vld [vmem:[%s879_s1 + $0x170] sm:$0xff]  ;;  %v196_v41 = vpack.c.bf16 %v130_v30, %v129_v29  ;;  %v148_v44 = vld [vmem:[%s879_s1 + $0x288] sm:$0xff]  ;;  %v60_v53 = vpack.c.bf16 %v27_v24, %v27_v24 }
  0x17   :  { %447 = vmatpush3.bf16.msra.mxu1 %v185_v5  ;;  %v114_v42 = vld [vmem:[%s879_s1 + $0x178] sm:$0xff]  ;;  %v172_v46 = vpack.c.bf16 %v82_v37, %v81_v36  ;;  %v205_v48 = vpack.c.bf16 %v148_v44, %v147_v43  ;;  %v131_v49 = vld [vmem:[%s879_s1 + $0x200] sm:$0xff]  ;;  %v132_v50 = vld [vmem:[%s879_s1 + $0x208] sm:$0xff] }
  0x18   :  { %448 = vmatprep.subr.bf16.mxu1 %v194_v11  ;;  %v61_v38 = vpack.c.bf16 %v35_v31, %v35_v31  ;;  %v36_v40 = vcombine.high %v34_v32, %v34_v32  ;;  %v188_v47 = vpack.c.bf16 %v114_v42, %v113_v39  ;;  %v149_v51 = vld [vmem:[%s879_s1 + $0x290] sm:$0xff]  ;;  %v150_v52 = vld [vmem:[%s879_s1 + $0x298] sm:$0xff]  ;;  %v197_v54 = vpack.c.bf16 %v132_v50, %v131_v49  ;;  %v163_v57 = vld [vmem:[%s879_s1 + $0x300] sm:$0xff] }
  0x19   :  { %427 = vmatpush3.bf16.msra.mxu0 %v170_v16  ;;  %v62_v55 = vpack.c.bf16 %v34_v32, %v34_v32  ;;  %v133_v56 = vld [vmem:[%s879_s1 + $0x210] sm:$0xff]  ;;  %v164_v58 = vld [vmem:[%s879_s1 + $0x308] sm:$0xff]  ;;  %v206_v59 = vpack.c.bf16 %v150_v52, %v149_v51  ;;  %v134_v60 = vld [vmem:[%s879_s1 + $0x218] sm:$0xff] }
  0x1a   :  { %428 = vmatprep.subr.bf16.mxu0 %v179_v20  ;;  %257 = vmatprep.mubr.bf16.mxu0 %v61_v38  ;;  %v63_v45 = vpack.c.bf16 %v36_v40, %v36_v40  ;;  %v213_v61 = vpack.c.bf16 %v164_v58, %v163_v57  ;;  %v17_v62 = vld [vmem:[%s878_s0 + $0x8] sm:$0x3f] }
  0x1b   :  { %449 = vmatpush3.bf16.msra.mxu1 %v186_v17 }
  0x1c   :  { %450 = vmatprep.subr.bf16.mxu1 %v195_v26  ;;  %297 = vmatprep.mubr.bf16.mxu1 %v63_v45 }
  0x1d   :  { %429 = vmatpush3.bf16.msra.mxu0 %v171_v33 }
  0x1e   :  { %430 = vmatprep.subr.bf16.mxu0 %v180_v35 }
  0x1f   :  { %451 = vmatpush3.bf16.msra.mxu1 %v187_v34 }
  0x20   :  { %452 = vmatprep.subr.bf16.mxu1 %v196_v41 }
  0x21   :  { %431 = vmatpush3.bf16.msra.mxu0 %v172_v46 }
  0x22   :  { %460 = vmatprep.subr.bf16.mxu0 %v205_v48 }
  0x23   :  { %453 = vmatpush3.bf16.msra.mxu1 %v188_v47 }
  0x24   :  { %8 = vsyncpa [#allocation3], 0  ;;  %v151_v63 = vld [vmem:[%s879_s1 + $0x2a0] sm:$0xff]  ;;  %v152_v0 = vld [vmem:[%s879_s1 + $0x2a8] sm:$0xff]  ;;  %v525_v1 = vmov 0.0   ;;  %v37_v2 = vcombine.high %v17_v62, %v17_v62  ;;  %v787_v3 = vrot.slane %v17_v62, %v692_v10  ;;  %258 = vmatmul.mubr.bf16.vlgmr.msra.gmra.mrb[0].mxu0 %v60_v53  ;;  %v198_v4 = vpack.c.bf16 %v134_v60, %v133_v56 }
  0x25   :  { %484 = vmatprep.subr.bf16.mxu1 %v525_v1  ;;  %461 = vmatpush3.bf16.msra.mxu0 %v197_v54  ;;  %v207_v7 = vpack.c.bf16 %v152_v0, %v151_v63  ;;  %v135_v8 = vld [vmem:[%s879_s1 + $0x220] sm:$0xff]  ;;  %v136_v9 = vld [vmem:[%s879_s1 + $0x228] sm:$0xff]  ;;  %v153_v11 = vld [vmem:[%s879_s1 + $0x2b0] sm:$0xff]  ;;  %vm526_vm0 = vmmov 0   ;;  %vm221_vm1 = vcmask 130048   ;;  %vm386_vm2 = vcmask 156672  }
  0x26   :  { %298 = vmatmul.mubr.bf16.vlgmr.msra.gmra.mrb[0].mxu1 %v62_v55  ;;  %v51_v5 = vrot.slane %v37_v2, %v692_v10  ;;  %v52_v6 = vcombine.high %v787_v3, %v787_v3  ;;  %462 = vmatprep.subr.bf16.mxu0 %v206_v59  ;;  %v154_v10 = vld [vmem:[%s879_s1 + $0x2b8] sm:$0xff]  ;;  %v199_v13 = vpack.c.bf16 %v136_v9, %v135_v8  ;;  %v137_v16 = vld [vmem:[%s879_s1 + $0x230] sm:$0xff]  ;;  %v155_v18 = vld [vmem:[%s879_s1 + $0x2c0] sm:$0xff] }
  0x27   :  { %485 = vmatpush3.bf16.msra.mxu1 %v213_v61  ;;  %486 = vmatprep.mubr.msk.bf16.mxu1 %vm526_vm0, %v525_v1  ;;  %v208_v15 = vpack.c.bf16 %v154_v10, %v153_v11  ;;  %v138_v17 = vld [vmem:[%s879_s1 + $0x238] sm:$0xff]  ;;  %v156_v19 = vld [vmem:[%s879_s1 + $0x2c8] sm:$0xff]  ;;  %v139_v22 = vld [vmem:[%s879_s1 + $0x240] sm:$0xff]  ;;  %v64_v43 = vpack.c.bf16 %v787_v3, %v787_v3 }
  0x28   :  { %v65_v12 = vpack.c.bf16 %v52_v6, %v52_v6  ;;  %v66_v14 = vpack.c.bf16 %v51_v5, %v51_v5  ;;  %v200_v20 = vpack.c.bf16 %v138_v17, %v137_v16  ;;  %v209_v21 = vpack.c.bf16 %v156_v19, %v155_v18  ;;  %v140_v23 = vld [vmem:[%s879_s1 + $0x248] sm:$0xff]  ;;  %v157_v24 = vld [vmem:[%s879_s1 + $0x2d0] sm:$0xff]  ;;  %v158_v25 = vld [vmem:[%s879_s1 + $0x2d8] sm:$0xff] }
  0x29   :  { %463 = vmatpush3.bf16.msra.mxu0 %v198_v4  ;;  %v201_v26 = vpack.c.bf16 %v140_v23, %v139_v22  ;;  %v210_v27 = vpack.c.bf16 %v158_v25, %v157_v24  ;;  %v141_v28 = vld [vmem:[%s879_s1 + $0x250] sm:$0xff]  ;;  %v142_v29 = vld [vmem:[%s879_s1 + $0x258] sm:$0xff]  ;;  %v159_v30 = vld [vmem:[%s879_s1 + $0x2e0] sm:$0xff] }
  0x2a   :  { %337 = vmatprep.mubr.bf16.mxu0 %v65_v12  ;;  %464 = vmatprep.subr.bf16.mxu0 %v207_v7  ;;  %v160_v31 = vld [vmem:[%s879_s1 + $0x2e8] sm:$0xff]  ;;  %v202_v32 = vpack.c.bf16 %v142_v29, %v141_v28  ;;  %v143_v34 = vld [vmem:[%s879_s1 + $0x260] sm:$0xff]  ;;  %v161_v36 = vld [vmem:[%s879_s1 + $0x2f0] sm:$0xff] }
  0x2b   :  { %v211_v33 = vpack.c.bf16 %v160_v31, %v159_v30  ;;  %v144_v35 = vld [vmem:[%s879_s1 + $0x268] sm:$0xff]  ;;  %v162_v37 = vld [vmem:[%s879_s1 + $0x2f8] sm:$0xff]  ;;  %v145_v40 = vld [vmem:[%s879_s1 + $0x270] sm:$0xff] }
  0x2c   :  { %v203_v38 = vpack.c.bf16 %v144_v35, %v143_v34  ;;  %v212_v39 = vpack.c.bf16 %v162_v37, %v161_v36  ;;  %v146_v41 = vld [vmem:[%s879_s1 + $0x278] sm:$0xff]  ;;  %v414_v45 = vld [vmem:[%s880_s2] ss:$0 sm:$0xff]  ;;  %s527_s1 = smov [#allocation2]  }
  0x2d   :  { %465 = vmatpush3.bf16.msra.mxu0 %v199_v13  ;;  %v204_v42 = vpack.c.bf16 %v146_v41, %v145_v40  ;;  %s406_s2 = sshll.u32 %s527_s1, 4  ;;  %s407_s2 = int_to_ptr.vmem [resolvable:$true] %s406_s2 }
  0x2e   :  { %487 = vmatmul.mubr.msk.bf16.vlgmr.msra.gmra.mrb[4].mxu1 %vm221_vm1, %v66_v14  ;;  %466 = vmatprep.subr.bf16.mxu0 %v208_v15  ;;  %s500_s23 = scalar_lea.vmem %s407_s2, 32  ;;  %p505_p1 = scmp.lt.s32.totalorder %s407_s2, %s407_s2 }
  0x2f   :  { %p501_p0 = scmp.ne.s32.totalorder %s407_s2, %s500_s23  ;;  %p506_p2 = scmp.lt.s32.totalorder %s500_s23, %s500_s23 }
  0x31   :  { %467 = vmatpush3.bf16.msra.mxu0 %v200_v20  ;;  %p507_p3 = por %p506_p2, %p505_p1 }
  0x32   :  { %468 = vmatprep.subr.bf16.mxu0 %v209_v21 }
  0x33   :  { %p508_p4 = pnand %p507_p3, %p501_p0 }
  0x35   :  { %469 = vmatpush3.bf16.msra.mxu0 %v201_v26 }
  0x36   :  { %470 = vmatprep.subr.bf16.mxu0 %v210_v27 }
  0x39   :  { %471 = vmatpush3.bf16.msra.mxu0 %v202_v32 }
  0x3a   :  { %472 = vmatprep.subr.bf16.mxu0 %v211_v33 }
  0x3d   :  { %473 = vmatpush3.bf16.msra.mxu0 %v203_v38 }
  0x3e   :  { %474 = vmatprep.subr.bf16.mxu0 %v212_v39 }
  0x41   :  { %475 = vmatpush3.bf16.msra.mxu0 %v204_v42 }
  0x44   :  { %338 = vmatmul.mubr.bf16.vlgmr.msra.gmra.mrb[4].mxu0 %v64_v43 }
  0xf7   :  { %v432_v44 = vpop.f32.mrb[0].mxu0 }
  0xf8   :  { %v433_v46 = vpop.f32.mrb[1].mxu0 }
  0xf9   :  { %v454_v47 = vpop.f32.mrb[0].mxu1  ;;  %v434_v48 = vadd.f32 %v433_v46, %v432_v44  ;;  %v435_v49 = vpop.f32.mrb[2].mxu0 }
  0xfa   :  { %v455_v50 = vpop.f32.mrb[1].mxu1  ;;  %v436_v51 = vpop.f32.mrb[3].mxu0 }
  0xfb   :  { %v456_v52 = vadd.f32 %v455_v50, %v454_v47  ;;  %v457_v53 = vpop.f32.mrb[2].mxu1  ;;  %v260_v54 = vadd.f32 %v434_v48, %v414_v45 }
  0xfc   :  { %v458_v55 = vpop.f32.mrb[3].mxu1 }
  0xfd   :  { %v300_v56 = vadd.f32 %v456_v52, %v260_v54 }
 0x101   :  { %v379_v57 = vpop.f32.mrb[4].mxu1 }
 0x102   :  { %v488_v58 = vpop.f32.mrb[5].mxu1 }
 0x103   :  { %v382_v59 = vpop.f32.mrb[6].mxu1 }
 0x104   :  { %v489_v60 = vpop.f32.mrb[7].mxu1 }
 0x117   :  { %v476_v61 = vpop.f32.mrb[4].mxu0 }
 0x118   :  { %v477_v62 = vpop.f32.mrb[5].mxu0 }
 0x119   :  { %v478_v63 = vadd.f32 %v477_v62, %v476_v61  ;;  %v479_v0 = vpop.f32.mrb[6].mxu0 }
 0x11a   :  { %v480_v1 = vpop.f32.mrb[7].mxu0 }
 0x11b   :  { %v340_v2 = vadd.f32 %v478_v63, %v300_v56 }
 0x11d   :  { %v380_v3 = vadd.f32 %v379_v57, %v340_v2 }
 0x11f   :  { %v385_v4 = vmax.f32 %v380_v3, 0.0 }
 0x121   :  { %v387_v5 = vsel %vm386_vm2, %v385_v4, -inf }
 0x122   :  { %388 = vmax.xlane.f32.xlu0 %v387_v5 }
 0x1af   :  { %v389_v6 = vpop.xlane.xlu0 %388 }
 0x1b0   :  { %v390_v7 = vsub.f32 %v385_v4, %v389_v6 }
 0x1b2   :  { %v391_v8 = vmul.f32 1.442695, %v390_v7 }
 0x1b4   :  { %496 = vpow2.f32 %v391_v8 }
 0x1be   :  { %v497_v9 = vpop.eup %496 }
 0x1bf   :  { %v393_v11 = vsel %vm386_vm2, %v497_v9, 0.0 }
 0x1c0   :  { %394 = vadd.xlane.f32.xlu0 %v393_v11 }
 0x24d   :  { %v395_v10 = vpop.xlane.xlu0 %394 }
 0x24e   :  { %498 = vlog2.f32 %v395_v10 }
 0x258   :  { %v499_v12 = vpop.eup %498 }
 0x259   :  { %v397_v13 = vmul.f32 0.6931472, %v499_v12 }
 0x25b   :  { %v398_v14 = vsub.f32 %v390_v7, %v397_v13 }
 0x25d   :  { %399 = vst.msk [vmem:[#allocation2] sm:$0x3] %vm386_vm2, %v398_v14 }
 0x25e   :  { %511 = shalt.err (!%p508_p4)
}
 0x25f   :  { %s512_s26 = scalar_lea.hbm %s881_s3, 32 }
 0x260   :  { %p513_p5 = scmp.ne.s32.totalorder %s881_s3, %s512_s26  ;;  %p516_p6 = scmp.lt.u32.totalorder %s512_s26, %s881_s3 }
 0x262   :  { %p518_p7 = pnand %p516_p6, %p513_p5 }
 0x264   :  { %521 = shalt.err (!%p518_p7)
}
 0x265   :  { %409 = dma.vmem_to_hbm [thread:$0]  %s407_s2, 32, %s881_s3, [#allocation3]  }
 0x266   :  { %522 = dma.done.wait [#allocation3], 32  }
 0x267   :  { %523 = vsyncadd [#allocation3], 4294967264 }
 0x268   :  { %413 = vsyncpa [#allocation3], 1 }

</bundles_post_ra>
